<compile_context>
chip_gen: v6e
topology: v6e:2x2x1
jax: 0.10.0
libtpu: 0.0.40
codegen_flags: <defaults>
</compile_context>

<pallas_src>
import jax
import jax.numpy as jnp
from jax.experimental import pallas as pl
from jax.experimental.pallas import tpu as pltpu

EMBED_DIM = 32   # stands in for Config.NUM_FACTORS

# Per-row VMEM footprint of one grid step (double-buffered):
#   ue (BT,D) + ie (BT,D) + bias (BT,1) + out (BT,1), each lane-padded to 128
#   -> 4 streams * 2 buffers * 128 lanes * 4 B = 4096 bytes per batch row.
_VMEM_BUDGET = 28 * 1024 * 1024          # stay under the 32 MiB scoped limit (all gens)
_BYTES_PER_ROW = 4 * 2 * 128 * 4         # 4096
BT_MAX = (_VMEM_BUDGET // _BYTES_PER_ROW) // 128 * 128    # = 7168 rows per grid step


def _round_up(x, m):
    return ((x + m - 1) // m) * m


def _cdiv(a, b):
    return (a + b - 1) // b


def mf_kernel(ue_ref, ie_ref, bias_ref, out_ref):
    # ue_ref  : VMEM (BT, D)  user embeddings (natural gather layout)
    # ie_ref  : VMEM (BT, D)  item embeddings
    # bias_ref: VMEM (BT, 1)  user_bias + item_bias + global_bias (pre-folded)
    # out_ref : VMEM (BT, 1)  predictions
    dot = jnp.sum(ue_ref[...] * ie_ref[...], axis=1, keepdims=True)   # (BT, 1)
    out_ref[...] = dot + bias_ref[...]


def mf_forward(params, user_ids, item_ids):
    """Forward pass of MatrixFactorization.

    params: dict with
      user_embedding: (num_users, D)
      item_embedding: (num_items, D)
      user_bias:      (num_users, 1)
      item_bias:      (num_items, 1)
      global_bias:    (1,)
    user_ids, item_ids: int32 (B,)
    Returns: float32 (B,) predictions.
    """
    B = int(user_ids.shape[0])
    D = int(params["user_embedding"].shape[1])

    # ---- tile / grid selection -------------------------------------------------
    Bp128 = _round_up(B, 128)
    n_tiles = max(1, _cdiv(Bp128, BT_MAX))
    if Bp128 >= 256:
        n_tiles = max(n_tiles, 2)          # v7x: keep both TensorCores busy
    BT = _round_up(_cdiv(Bp128, n_tiles), 128)
    Bp = n_tiles * BT
    pad = Bp - B

    # Pad the tiny index vectors (not the gathered data) -> no extra HBM pass.
    uid = jnp.pad(user_ids.astype(jnp.int32), (0, pad))
    iid = jnp.pad(item_ids.astype(jnp.int32), (0, pad))

    # Embedding gathers stay in XLA glue; the gathered (Bp, D) arrays feed the
    # kernel directly in their natural layout (no transpose round trip).
    ue = jnp.take(params["user_embedding"], uid, axis=0).astype(jnp.float32)   # (Bp, D)
    ie = jnp.take(params["item_embedding"], iid, axis=0).astype(jnp.float32)   # (Bp, D)

    # Fold user + item + global bias into a single (Bp, 1) kernel operand.
    bias = (jnp.take(params["user_bias"][:, 0], uid, axis=0)
            + jnp.take(params["item_bias"][:, 0], iid, axis=0)
            + params["global_bias"][0]).astype(jnp.float32).reshape(Bp, 1)

    cost = pl.CostEstimate(
        flops=2 * Bp * D + Bp,
        transcendentals=0,
        bytes_accessed=(2 * Bp * D + 2 * Bp) * 4,
    )

    out = pl.pallas_call(
        mf_kernel,
        out_shape=jax.ShapeDtypeStruct((Bp, 1), jnp.float32),
        grid=(n_tiles,),
        in_specs=[
            pl.BlockSpec((BT, D), lambda i: (i, 0)),   # user embeddings
            pl.BlockSpec((BT, D), lambda i: (i, 0)),   # item embeddings
            pl.BlockSpec((BT, 1), lambda i: (i, 0)),   # folded bias
        ],
        out_specs=pl.BlockSpec((BT, 1), lambda i: (i, 0)),
        compiler_params=pltpu.CompilerParams(
            dimension_semantics=("parallel",),
            vmem_limit_bytes=32 * 1024 * 1024,
        ),
        cost_estimate=cost,
    )(ue, ie, bias)
    return out[:B, 0]                                                           # (B,)


def init_params(key, num_users, num_items, embedding_dim=EMBED_DIM):
    k1, k2, k3, k4 = jax.random.split(key, 4)
    return {
        "user_embedding": 0.01 * jax.random.normal(k1, (num_users, embedding_dim), jnp.float32),
        "item_embedding": 0.01 * jax.random.normal(k2, (num_items, embedding_dim), jnp.float32),
        "user_bias":      0.01 * jax.random.normal(k3, (num_users, 1), jnp.float32),
        "item_bias":      0.01 * jax.random.normal(k4, (num_items, 1), jnp.float32),
        "global_bias":    jnp.zeros((1,), jnp.float32),
    }


def _reference(params, user_ids, item_ids):
    ue = params["user_embedding"][user_ids]
    ie = params["item_embedding"][item_ids]
    return ((ue * ie).sum(axis=1)
            + params["user_bias"][user_ids][:, 0]
            + params["item_bias"][item_ids][:, 0]
            + params["global_bias"][0])


if __name__ == "__main__":
    key = jax.random.PRNGKey(0)
    num_users, num_items = 32, 48
    kp, ku, ki = jax.random.split(key, 3)
    params = init_params(kp, num_users, num_items, EMBED_DIM)

    # Case 1: small batch (single 128-row tile).
    B = 8
    user_ids = jax.random.randint(ku, (B,), 0, num_users, dtype=jnp.int32)
    item_ids = jax.random.randint(ki, (B,), 0, num_items, dtype=jnp.int32)
    pred = jax.block_until_ready(mf_forward(params, user_ids, item_ids))
    ref = _reference(params, user_ids, item_ids)
    assert pred.shape == (B,)
    assert jnp.allclose(pred, ref, atol=1e-5, rtol=1e-5)

    # Case 2: larger, non-multiple-of-128 batch to exercise the multi-tile grid
    # path (n_tiles=2, BT=2560, minimal padding waste).
    B2 = 5000
    ku2, ki2 = jax.random.split(ku)
    user_ids2 = jax.random.randint(ku2, (B2,), 0, num_users, dtype=jnp.int32)
    item_ids2 = jax.random.randint(ki2, (B2,), 0, num_items, dtype=jnp.int32)
    pred2 = jax.block_until_ready(mf_forward(params, user_ids2, item_ids2))
    ref2 = _reference(params, user_ids2, item_ids2)
    assert pred2.shape == (B2,)
    assert jnp.allclose(pred2, ref2, atol=1e-5, rtol=1e-5)

    print("KERNEL_OK")
</pallas_src>

<mosaic_0001>
module attributes {stable_mosaic.version = 11 : i64} {
  func.func @mf_kernel(%arg0: i32, %arg1: memref<128x32xf32, #tpu.memory_space<vmem>>, %arg2: memref<128x32xf32, #tpu.memory_space<vmem>>, %arg3: memref<128x1xf32, #tpu.memory_space<vmem>>, %arg4: memref<128x1xf32, #tpu.memory_space<vmem>>) attributes {dimension_semantics = [#tpu.dimension_semantics<parallel>], iteration_bounds = array<i64: 1>, scalar_prefetch = 0 : i64, scratch_operands = 0 : i64, tpu.core_type = #tpu.core_type<tc>, window_params = [{transform_indices = @transform_0, window_bounds = array<i64: 128, 32>}, {transform_indices = @transform_1, window_bounds = array<i64: 128, 32>}, {transform_indices = @transform_2, window_bounds = array<i64: 128, 1>}, {transform_indices = @transform_3, window_bounds = array<i64: 128, 1>}]} {
    %c0 = arith.constant 0 : index
    %c0_0 = arith.constant 0 : index
    %0 = vector.load %arg1[%c0, %c0_0] : memref<128x32xf32, #tpu.memory_space<vmem>>, vector<128x32xf32>
    %c0_1 = arith.constant 0 : index
    %c0_2 = arith.constant 0 : index
    %1 = vector.load %arg2[%c0_1, %c0_2] : memref<128x32xf32, #tpu.memory_space<vmem>>, vector<128x32xf32>
    %2 = arith.mulf %0, %1 : vector<128x32xf32>
    %cst = arith.constant dense<0.000000e+00> : vector<128xf32>
    %3 = vector.multi_reduction <add>, %2, %cst [1] : vector<128x32xf32> to vector<128xf32>
    %4 = vector.shape_cast %3 : vector<128xf32> to vector<128x1xf32>
    %c0_3 = arith.constant 0 : index
    %c0_4 = arith.constant 0 : index
    %5 = vector.load %arg3[%c0_3, %c0_4] : memref<128x1xf32, #tpu.memory_space<vmem>>, vector<128x1xf32>
    %6 = arith.addf %4, %5 : vector<128x1xf32>
    %c0_5 = arith.constant 0 : index
    %c0_6 = arith.constant 0 : index
    %7 = vector.load %arg4[%c0_5, %c0_6] : memref<128x1xf32, #tpu.memory_space<vmem>>, vector<128x1xf32>
    tpu.vector_store %arg4[%c0_5, %c0_6], %6 {strides = array<i32>} : memref<128x1xf32, #tpu.memory_space<vmem>>, vector<128x1xf32>,
    return
  }
  func.func @transform_0(%arg0: i32) -> (i32, i32) {
    %c0_i32 = arith.constant 0 : i32
    %c0_i32_0 = arith.constant 0 : i32
    return %arg0, %c0_i32 : i32, i32
  }
  func.func @transform_1(%arg0: i32) -> (i32, i32) {
    %c0_i32 = arith.constant 0 : i32
    %c0_i32_0 = arith.constant 0 : i32
    return %arg0, %c0_i32 : i32, i32
  }
  func.func @transform_2(%arg0: i32) -> (i32, i32) {
    %c0_i32 = arith.constant 0 : i32
    %c0_i32_0 = arith.constant 0 : i32
    return %arg0, %c0_i32 : i32, i32
  }
  func.func @transform_3(%arg0: i32) -> (i32, i32) {
    %c0_i32 = arith.constant 0 : i32
    %c0_i32_0 = arith.constant 0 : i32
    return %arg0, %c0_i32 : i32, i32
  }
}

</mosaic_0001>

<bundles_post_ra>
// kernel: tpu_custom_call.1
= control target key start
LH: loop header
LB: loop body
LE: loop exit
PB: predicated region body
PF: predicated region fallthrough
CT: control target
= control target key end

     0   :  { %vm62_vm0 = vcmask 261120   ;;  %vm143_vm1 = vcmask 7168   ;;  %s408_s0 = inlined_call_operand.vmem [shape: f32[128,32], index: 0, kind: input, shape index: {}]   ;;  %s409_s1 = inlined_call_operand.vmem [shape: f32[128,32], index: 1, kind: input, shape index: {}]   ;;  %s410_s2 = inlined_call_operand.vmem [shape: f32[128,1], index: 2, kind: input, shape index: {}]   ;;  %s411_s3 = inlined_call_operand.vmem [shape: f32[128,1], index: 3, kind: output, shape index: {}]  }
   0x1   :  { %v16_v0 = vld [vmem:[%s408_s0 + $0x10] sm:$0xff]  ;;  %v14_v2 = vld [vmem:[%s408_s0] sm:$0xff]  ;;  %v17_v5 = vld [vmem:[%s408_s0 + $0x18] sm:$0xff] }
   0x2   :  { %v32_v1 = vld [vmem:[%s409_s1 + $0x10] sm:$0xff]  ;;  %v30_v4 = vld [vmem:[%s409_s1] sm:$0xff]  ;;  %v33_v6 = vld [vmem:[%s409_s1 + $0x18] sm:$0xff] }
   0x3   :  { %v48_v3 = vmul.f32 %v32_v1, %v16_v0  ;;  %v46_v7 = vmul.f32 %v30_v4, %v14_v2  ;;  %v49_v8 = vmul.f32 %v33_v6, %v17_v5  ;;  %v15_v9 = vld [vmem:[%s408_s0 + $0x8] sm:$0xff]  ;;  %v18_v15 = vld [vmem:[%s408_s0 + $0x20] sm:$0xff]  ;;  %v21_v22 = vld [vmem:[%s408_s0 + $0x38] sm:$0xff] }
   0x4   :  { %v31_v10 = vld [vmem:[%s409_s1 + $0x8] sm:$0xff]  ;;  %v34_v16 = vld [vmem:[%s409_s1 + $0x20] sm:$0xff]  ;;  %v37_v23 = vld [vmem:[%s409_s1 + $0x38] sm:$0xff] }
   0x5   :  { %v19_v11 = vld [vmem:[%s408_s0 + $0x28] sm:$0xff]  ;;  %v69_v12 = vsel %vm62_vm0, %v48_v3, 0.0  ;;  %v47_v13 = vmul.f32 %v31_v10, %v15_v9  ;;  %v63_v17 = vsel %vm62_vm0, %v46_v7, 0.0  ;;  %v72_v18 = vsel %vm62_vm0, %v49_v8, 0.0  ;;  %v20_v24 = vld [vmem:[%s408_s0 + $0x30] sm:$0xff]  ;;  %v22_v32 = vld [vmem:[%s408_s0 + $0x40] sm:$0xff] }
   0x6   :  { %v35_v14 = vld [vmem:[%s409_s1 + $0x28] sm:$0xff]  ;;  %70 = vadd.xlane.f32.xlu1 %v69_v12  ;;  %64 = vadd.xlane.f32.xlu0 %v63_v17  ;;  %v50_v21 = vmul.f32 %v34_v16, %v18_v15  ;;  %v36_v25 = vld [vmem:[%s409_s1 + $0x30] sm:$0xff]  ;;  %v53_v27 = vmul.f32 %v37_v23, %v21_v22  ;;  %v38_v33 = vld [vmem:[%s409_s1 + $0x40] sm:$0xff] }
   0x7   :  { %v51_v19 = vmul.f32 %v35_v14, %v19_v11  ;;  %v66_v20 = vsel %vm62_vm0, %v47_v13, 0.0  ;;  %v52_v29 = vmul.f32 %v36_v25, %v20_v24  ;;  %v23_v30 = vld [vmem:[%s408_s0 + $0x48] sm:$0xff]  ;;  %v54_v37 = vmul.f32 %v38_v33, %v22_v32  ;;  %v25_v38 = vld [vmem:[%s408_s0 + $0x58] sm:$0xff]  ;;  %v24_v40 = vld [vmem:[%s408_s0 + $0x50] sm:$0xff] }
   0x8   :  { %v75_v28 = vsel %vm62_vm0, %v50_v21, 0.0  ;;  %v39_v31 = vld [vmem:[%s409_s1 + $0x48] sm:$0xff]  ;;  %v84_v34 = vsel %vm62_vm0, %v53_v27, 0.0  ;;  %v41_v39 = vld [vmem:[%s409_s1 + $0x58] sm:$0xff]  ;;  %v40_v41 = vld [vmem:[%s409_s1 + $0x50] sm:$0xff] }
   0x9   :  { %v78_v26 = vsel %vm62_vm0, %v51_v19, 0.0  ;;  %v55_v35 = vmul.f32 %v39_v31, %v23_v30  ;;  %v81_v36 = vsel %vm62_vm0, %v52_v29, 0.0  ;;  %v57_v43 = vmul.f32 %v41_v39, %v25_v38  ;;  %v27_v46 = vld [vmem:[%s408_s0 + $0x68] sm:$0xff]  ;;  %v26_v48 = vld [vmem:[%s408_s0 + $0x60] sm:$0xff]  ;;  %v29_v54 = vld [vmem:[%s408_s0 + $0x78] sm:$0xff] }
   0xa   :  { %73 = vadd.xlane.f32.xlu1 %v72_v18  ;;  %67 = vadd.xlane.f32.xlu0 %v66_v20  ;;  %v87_v44 = vsel %vm62_vm0, %v54_v37, 0.0  ;;  %v56_v45 = vmul.f32 %v40_v41, %v24_v40  ;;  %v43_v47 = vld [vmem:[%s409_s1 + $0x68] sm:$0xff]  ;;  %v42_v49 = vld [vmem:[%s409_s1 + $0x60] sm:$0xff]  ;;  %v45_v55 = vld [vmem:[%s409_s1 + $0x78] sm:$0xff] }
   0xb   :  { %v90_v42 = vsel %vm62_vm0, %v55_v35, 0.0  ;;  %v96_v50 = vsel %vm62_vm0, %v57_v43, 0.0  ;;  %v59_v51 = vmul.f32 %v43_v47, %v27_v46  ;;  %v58_v53 = vmul.f32 %v42_v49, %v26_v48  ;;  %v28_v56 = vld [vmem:[%s408_s0 + $0x70] sm:$0xff]  ;;  %v111_v1 = vld [vmem:[%s410_s2] sm:$0xff]  ;;  %v114_v6 = vld [vmem:[%s410_s2 + $0x18] sm:$0xff] }
   0xc   :  { %v93_v52 = vsel %vm62_vm0, %v56_v45, 0.0  ;;  %v44_v57 = vld [vmem:[%s409_s1 + $0x70] sm:$0xff]  ;;  %v61_v59 = vmul.f32 %v45_v55, %v29_v54  ;;  %v112_v7 = vld [vmem:[%s410_s2 + $0x8] sm:$0xff]  ;;  %v115_v13 = vld [vmem:[%s410_s2 + $0x20] sm:$0xff] }
   0xd   :  { %v102_v58 = vsel %vm62_vm0, %v59_v51, 0.0  ;;  %v99_v60 = vsel %vm62_vm0, %v58_v53, 0.0  ;;  %v60_v61 = vmul.f32 %v44_v57, %v28_v56  ;;  %v113_v0 = vld [vmem:[%s410_s2 + $0x10] sm:$0xff]  ;;  %v116_v12 = vld [vmem:[%s410_s2 + $0x28] sm:$0xff]  ;;  %v118_v18 = vld [vmem:[%s410_s2 + $0x38] sm:$0xff] }
   0xe   :  { %79 = vadd.xlane.f32.xlu1 %v78_v26  ;;  %76 = vadd.xlane.f32.xlu0 %v75_v28  ;;  %v108_v62 = vsel %vm62_vm0, %v61_v59, 0.0  ;;  %v117_v19 = vld [vmem:[%s410_s2 + $0x30] sm:$0xff]  ;;  %v120_v24 = vld [vmem:[%s410_s2 + $0x48] sm:$0xff]  ;;  %v119_v25 = vld [vmem:[%s410_s2 + $0x40] sm:$0xff] }
   0xf   :  { %v105_v63 = vsel %vm62_vm0, %v60_v61, 0.0  ;;  %v122_v30 = vld [vmem:[%s410_s2 + $0x58] sm:$0xff]  ;;  %v121_v31 = vld [vmem:[%s410_s2 + $0x50] sm:$0xff]  ;;  %v123_v37 = vld [vmem:[%s410_s2 + $0x60] sm:$0xff] }
  0x10   :  { %v125_v43 = vld [vmem:[%s410_s2 + $0x70] sm:$0xff] }
  0x12   :  { %85 = vadd.xlane.f32.xlu1 %v84_v34  ;;  %82 = vadd.xlane.f32.xlu0 %v81_v36  ;;  %v124_v36 = vld [vmem:[%s410_s2 + $0x68] sm:$0xff] }
  0x16   :  { %91 = vadd.xlane.f32.xlu1 %v90_v42  ;;  %88 = vadd.xlane.f32.xlu0 %v87_v44  ;;  %v126_v42 = vld [vmem:[%s410_s2 + $0x78] sm:$0xff] }
  0x1a   :  { %97 = vadd.xlane.f32.xlu1 %v96_v50  ;;  %94 = vadd.xlane.f32.xlu0 %v93_v52 }
  0x1e   :  { %103 = vadd.xlane.f32.xlu1 %v102_v58  ;;  %100 = vadd.xlane.f32.xlu0 %v99_v60 }
  0x22   :  { %109 = vadd.xlane.f32.xlu1 %v108_v62  ;;  %106 = vadd.xlane.f32.xlu0 %v105_v63 }
  0x8f   :  { %v71_v2 = vpop.xlane.xlu1 %70  ;;  %v65_v4 = vpop.xlane.xlu0 %64 }
  0x90   :  { %v129_v3 = vadd.f32 %v113_v0, %v71_v2  ;;  %v127_v5 = vadd.f32 %v111_v1, %v65_v4 }
  0x92   :  { %146 = vst.msk [vmem:[%s411_s3 + $0x10] sm:$0xff] %vm143_vm1, %v129_v3  ;;  %144 = vst.msk [vmem:[%s411_s3] sm:$0xff] %vm143_vm1, %v127_v5 }
  0x93   :  { %v74_v8 = vpop.xlane.xlu1 %73  ;;  %v68_v10 = vpop.xlane.xlu0 %67 }
  0x94   :  { %v130_v9 = vadd.f32 %v114_v6, %v74_v8  ;;  %v128_v11 = vadd.f32 %v112_v7, %v68_v10 }
  0x96   :  { %147 = vst.msk [vmem:[%s411_s3 + $0x18] sm:$0xff] %vm143_vm1, %v130_v9  ;;  %145 = vst.msk [vmem:[%s411_s3 + $0x8] sm:$0xff] %vm143_vm1, %v128_v11 }
  0x97   :  { %v80_v14 = vpop.xlane.xlu1 %79  ;;  %v77_v16 = vpop.xlane.xlu0 %76 }
  0x98   :  { %v132_v15 = vadd.f32 %v116_v12, %v80_v14  ;;  %v131_v17 = vadd.f32 %v115_v13, %v77_v16 }
  0x9a   :  { %149 = vst.msk [vmem:[%s411_s3 + $0x28] sm:$0xff] %vm143_vm1, %v132_v15  ;;  %148 = vst.msk [vmem:[%s411_s3 + $0x20] sm:$0xff] %vm143_vm1, %v131_v17 }
  0x9b   :  { %v86_v20 = vpop.xlane.xlu1 %85  ;;  %v83_v22 = vpop.xlane.xlu0 %82 }
  0x9c   :  { %v134_v21 = vadd.f32 %v118_v18, %v86_v20  ;;  %v133_v23 = vadd.f32 %v117_v19, %v83_v22 }
  0x9e   :  { %151 = vst.msk [vmem:[%s411_s3 + $0x38] sm:$0xff] %vm143_vm1, %v134_v21  ;;  %150 = vst.msk [vmem:[%s411_s3 + $0x30] sm:$0xff] %vm143_vm1, %v133_v23 }
  0x9f   :  { %v92_v26 = vpop.xlane.xlu1 %91  ;;  %v89_v28 = vpop.xlane.xlu0 %88 }
  0xa0   :  { %v136_v27 = vadd.f32 %v120_v24, %v92_v26  ;;  %v135_v29 = vadd.f32 %v119_v25, %v89_v28 }
  0xa2   :  { %153 = vst.msk [vmem:[%s411_s3 + $0x48] sm:$0xff] %vm143_vm1, %v136_v27  ;;  %152 = vst.msk [vmem:[%s411_s3 + $0x40] sm:$0xff] %vm143_vm1, %v135_v29 }
  0xa3   :  { %v98_v32 = vpop.xlane.xlu1 %97  ;;  %v95_v34 = vpop.xlane.xlu0 %94 }
  0xa4   :  { %v138_v33 = vadd.f32 %v122_v30, %v98_v32  ;;  %v137_v35 = vadd.f32 %v121_v31, %v95_v34 }
  0xa6   :  { %155 = vst.msk [vmem:[%s411_s3 + $0x58] sm:$0xff] %vm143_vm1, %v138_v33  ;;  %154 = vst.msk [vmem:[%s411_s3 + $0x50] sm:$0xff] %vm143_vm1, %v137_v35 }
  0xa7   :  { %v104_v38 = vpop.xlane.xlu1 %103  ;;  %v101_v40 = vpop.xlane.xlu0 %100 }
  0xa8   :  { %v140_v39 = vadd.f32 %v124_v36, %v104_v38  ;;  %v139_v41 = vadd.f32 %v123_v37, %v101_v40 }
  0xaa   :  { %157 = vst.msk [vmem:[%s411_s3 + $0x68] sm:$0xff] %vm143_vm1, %v140_v39  ;;  %156 = vst.msk [vmem:[%s411_s3 + $0x60] sm:$0xff] %vm143_vm1, %v139_v41 }
  0xab   :  { %v110_v44 = vpop.xlane.xlu1 %109  ;;  %v107_v46 = vpop.xlane.xlu0 %106 }
  0xac   :  { %v142_v45 = vadd.f32 %v126_v42, %v110_v44  ;;  %v141_v47 = vadd.f32 %v125_v43, %v107_v46 }
  0xae   :  { %159 = vst.msk [vmem:[%s411_s3 + $0x78] sm:$0xff] %vm143_vm1, %v142_v45  ;;  %158 = vst.msk [vmem:[%s411_s3 + $0x70] sm:$0xff] %vm143_vm1, %v141_v47 }

</bundles_post_ra>
